<compile_context>
chip_gen: v7x
topology: tpu7x:2x2x1
jax: 0.10.0
libtpu: 0.0.40
codegen_flags: <defaults>
</compile_context>

<pallas_src>
import functools

import jax
import jax.numpy as jnp
from jax import lax
from jax.experimental import pallas as pl
from jax.experimental.pallas import tpu as pltpu

EPS_BN = 1e-5  # nn.BatchNorm1d default eps


def _round_up(x, m):
    return (x + m - 1) // m * m


def sim_mlp_kernel(x_ref, l1_ref, l2_ref, l3_ref, out_ref,
                   sum1_ref, sq1_ref, sum2_ref, sq2_ref,
                   *, H, d1, d2, E, TE):
    """Edge-tiled 3-pass MLP with global BatchNorm; edges live on the 128-lane axis.

    grid = (pass, edge_tile): pass 0 accumulates BN1 stats, pass 1 accumulates BN2 stats,
    pass 2 emits the sigmoid scores.
    """
    p = pl.program_id(0)
    t = pl.program_id(1)

    @pl.when(jnp.logical_and(p == 0, t == 0))
    def _init_stats():
        sum1_ref[...] = jnp.zeros_like(sum1_ref)
        sq1_ref[...] = jnp.zeros_like(sq1_ref)
        sum2_ref[...] = jnp.zeros_like(sum2_ref)
        sq2_ref[...] = jnp.zeros_like(sq2_ref)

    # ---- Layer 1 (needed by every pass): z1 = W1^T @ x^T + b1 -> [d1, TE] -------------
    x = x_ref[...]                                    # [H, TE], edges on lanes
    w1t = l1_ref[:, 0:H]                              # [d1, H]
    b1 = l1_ref[:, H:H + 1]                           # [d1, 1]
    g1 = l1_ref[:, H + 1:H + 2]
    be1 = l1_ref[:, H + 2:H + 3]
    z1 = jnp.dot(w1t, x, preferred_element_type=jnp.float32) + b1

    # Column-validity vector: excludes E-padding lanes from the BN statistics and routes
    # the lane (axis=-1) reductions through the otherwise idle MXU.
    rem = E - t * TE
    colv = (lax.broadcasted_iota(jnp.int32, (TE, 1), 0) < rem).astype(jnp.float32)

    inv_e = 1.0 / float(E)

    # Keep every output-block visit written (passes 0/1 just clear it; pass 2 overwrites).
    @pl.when(p < 2)
    def _clear_out():
        out_ref[...] = jnp.zeros_like(out_ref)

    @pl.when(p == 0)
    def _pass0_bn1_stats():
        sum1_ref[...] += jnp.dot(z1, colv, preferred_element_type=jnp.float32)
        sq1_ref[...] += jnp.dot(z1 * z1, colv, preferred_element_type=jnp.float32)

    @pl.when(p > 0)
    def _pass12():
        # BN1 (global batch mean, biased variance) + ReLU with folded per-feature scale.
        mean1 = sum1_ref[...] * inv_e                  # [d1, 1]
        var1 = sq1_ref[...] * inv_e - mean1 * mean1
        scale1 = g1 * lax.rsqrt(var1 + EPS_BN)
        h1 = jnp.maximum((z1 - mean1) * scale1 + be1, 0.0)       # [d1, TE]

        # ---- Layer 2: z2 = W2^T @ h1 + b2 -> [d2, TE] ---------------------------------
        w2t = l2_ref[:, 0:d1]
        b2 = l2_ref[:, d1:d1 + 1]
        g2 = l2_ref[:, d1 + 1:d1 + 2]
        be2 = l2_ref[:, d1 + 2:d1 + 3]
        z2 = jnp.dot(w2t, h1, preferred_element_type=jnp.float32) + b2

        @pl.when(p == 1)
        def _pass1_bn2_stats():
            sum2_ref[...] += jnp.dot(z2, colv, preferred_element_type=jnp.float32)
            sq2_ref[...] += jnp.dot(z2 * z2, colv, preferred_element_type=jnp.float32)

        @pl.when(p == 2)
        def _pass2_output():
            mean2 = sum2_ref[...] * inv_e
            var2 = sq2_ref[...] * inv_e - mean2 * mean2
            scale2 = g2 * lax.rsqrt(var2 + EPS_BN)
            h2 = jnp.maximum((z2 - mean2) * scale2 + be2, 0.0)   # [d2, TE]

            # ---- Layer 3 + Sigmoid, emitted lane-dense as [1, TE] ----------------------
            w3t = l3_ref[:, 0:d2]                      # [1, d2]
            b3 = l3_ref[:, d2:d2 + 1]                  # [1, 1]
            z3 = jnp.dot(w3t, h2, preferred_element_type=jnp.float32) + b3
            out_ref[...] = jax.nn.sigmoid(z3)


def sim_model_forward(he_drug, he_disease, edge_src_drug, edge_dst_disease,
                      params, *, tile_e=2048):
    """SimModel.forward: he = h (identity feature_init), then MLPPredictor over the
    'treath' edges (Drug src -> Disease dst). One edge-tiled Pallas call."""
    he_drug = he_drug.astype(jnp.float32)
    he_disease = he_disease.astype(jnp.float32)

    E = int(edge_src_drug.shape[0])
    Fd = int(he_drug.shape[1])
    Fz = int(he_disease.shape[1])
    H = Fd + Fz
    d1 = int(params["w1"].shape[1])
    d2 = int(params["w2"].shape[1])

    # apply_edges gather + concat in the wrapper (XLA gather), presented to the kernel as
    # an edges-on-lanes [H, E_pad] slab.
    src = edge_src_drug.astype(jnp.int32)
    dst = edge_dst_disease.astype(jnp.int32)
    x = jnp.concatenate([jnp.take(he_drug, src, axis=0),
                         jnp.take(he_disease, dst, axis=0)], axis=1)   # [E, H]
    xT = x.T                                                           # [H, E]

    # Edge tile: multiple of 128 lanes, capped so the double-buffered edge tile stays well
    # under v7x's 64 MiB VMEM.
    te_cap = max(128, ((24 * 2 ** 20) // (2 * 4 * H)) // 128 * 128)
    TE = max(128, min(tile_e, te_cap, _round_up(E, 128)))
    E_pad = _round_up(E, TE)
    n_tiles = E_pad // TE
    if E_pad > E:
        xT = jnp.pad(xT, ((0, 0), (0, E_pad - E)))

    # Parameters packed into 3 transposed per-layer slabs (stay VMEM resident).
    l1 = jnp.concatenate([params["w1"].T, params["b1"].T,
                          params["g1"].T, params["be1"].T], axis=1)    # [d1, H+3]
    l2 = jnp.concatenate([params["w2"].T, params["b2"].T,
                          params["g2"].T, params["be2"].T], axis=1)    # [d2, d1+3]
    l3 = jnp.concatenate([params["w3"].T, params["b3"]], axis=1)       # [1, d2+1]

    slab_elems = l1.size + l2.size + l3.size
    vmem_est = 4 * (2 * H * TE + 2 * TE + 2 * slab_elems + 4 * 128 * (d1 + d2)) + (2 << 20)
    compiler_params = pltpu.CompilerParams(
        dimension_semantics=("arbitrary", "arbitrary"),
        vmem_limit_bytes=int(min(48 * 2 ** 20, max(vmem_est, 16 * 2 ** 20))),
    )
    cost = pl.CostEstimate(
        flops=int(2 * E_pad * (3 * H * d1 + 2 * d1 * d2 + d2 + 2 * d1 + 2 * d2)),
        transcendentals=int(E_pad + 2 * (d1 + d2)),
        bytes_accessed=int(4 * (3 * H * E_pad + 3 * E_pad + 3 * slab_elems)),
    )

    # TODO(synk): on v7x, split the edge-tile axis across the 2 TensorCores (per-core
    # partial BN sums + a tiny combine step) instead of running both axes 'arbitrary'.
    out = pl.pallas_call(
        functools.partial(sim_mlp_kernel, H=H, d1=d1, d2=d2, E=E, TE=TE),
        out_shape=jax.ShapeDtypeStruct((1, E_pad), jnp.float32),
        grid_spec=pltpu.PrefetchScalarGridSpec(
            num_scalar_prefetch=0,
            grid=(3, n_tiles),                                   # (pass, edge_tile)
            in_specs=[
                pl.BlockSpec((H, TE), lambda p, t: (0, t)),      # streamed edge tile
                pl.BlockSpec(l1.shape, lambda p, t: (0, 0)),     # VMEM-resident slabs
                pl.BlockSpec(l2.shape, lambda p, t: (0, 0)),
                pl.BlockSpec(l3.shape, lambda p, t: (0, 0)),
            ],
            out_specs=pl.BlockSpec((1, TE), lambda p, t: (0, t)),
            scratch_shapes=[pltpu.VMEM((d1, 1), jnp.float32),    # BN1 sum
                            pltpu.VMEM((d1, 1), jnp.float32),    # BN1 sum of squares
                            pltpu.VMEM((d2, 1), jnp.float32),    # BN2 sum
                            pltpu.VMEM((d2, 1), jnp.float32)],   # BN2 sum of squares
        ),
        compiler_params=compiler_params,
        cost_estimate=cost,
    )(xT, l1, l2, l3)

    return out[0, :E]                                            # .squeeze(1) -> [E]


def init_predictor_params(key, h_feats):
    """nn.Linear default init (U(-1/sqrt(fan_in), 1/sqrt(fan_in))); BN gamma=1, beta=0."""
    d1, d2 = h_feats // 2, h_feats // 4
    k = jax.random.split(key, 3)

    def lin(kk, fan_in, fan_out):
        kw, kb = jax.random.split(kk)
        bound = 1.0 / float(fan_in) ** 0.5
        w = jax.random.uniform(kw, (fan_in, fan_out), jnp.float32, -bound, bound)
        b = jax.random.uniform(kb, (1, fan_out), jnp.float32, -bound, bound)
        return w, b

    w1, b1 = lin(k[0], h_feats, d1)
    w2, b2 = lin(k[1], d1, d2)
    w3, b3 = lin(k[2], d2, 1)
    return {
        "w1": w1, "b1": b1,
        "g1": jnp.ones((1, d1), jnp.float32), "be1": jnp.zeros((1, d1), jnp.float32),
        "w2": w2, "b2": b2,
        "g2": jnp.ones((1, d2), jnp.float32), "be2": jnp.zeros((1, d2), jnp.float32),
        "w3": w3, "b3": b3,
    }


def sim_model_reference(he_drug, he_disease, src, dst, params):
    """Pure-JAX reference mirroring the PyTorch module (BatchNorm1d training mode)."""
    x = jnp.concatenate([he_drug[src], he_disease[dst]], axis=1)

    def bn(z, g, b):
        m = jnp.mean(z, axis=0, keepdims=True)
        v = jnp.mean((z - m) ** 2, axis=0, keepdims=True)
        return (z - m) * (g / jnp.sqrt(v + EPS_BN)) + b

    h1 = jnp.maximum(bn(x @ params["w1"] + params["b1"], params["g1"], params["be1"]), 0.0)
    h2 = jnp.maximum(bn(h1 @ params["w2"] + params["b2"], params["g2"], params["be2"]), 0.0)
    return jax.nn.sigmoid(h2 @ params["w3"] + params["b3"])[:, 0]


# TODO(synk): BatchNorm running_mean/running_var buffer updates (PyTorch training-mode side
# effect) are not emulated; only the returned edge scores are reproduced.

if __name__ == "__main__":
    key = jax.random.PRNGKey(0)
    k_hd, k_hz, k_e1, k_e2, k_par = jax.random.split(key, 5)

    # Small shapes consistent with the module.
    feat_drug = 16          # Drug 'he' dim
    feat_disease = 16       # Disease 'he' dim
    n_drug = 6
    n_disease = 5
    n_edges = 8
    h_feats = feat_drug + feat_disease      # DNN_dim = 32 -> d1 = 16, d2 = 8

    he_drug = jax.random.normal(k_hd, (n_drug, feat_drug), jnp.float32)
    he_disease = jax.random.normal(k_hz, (n_disease, feat_disease), jnp.float32)
    edge_src = jax.random.randint(k_e1, (n_edges,), 0, n_drug)
    edge_dst = jax.random.randint(k_e2, (n_edges,), 0, n_disease)

    params = init_predictor_params(k_par, h_feats)

    fwd = jax.jit(sim_model_forward)
    scores = fwd(he_drug, he_disease, edge_src, edge_dst, params)
    jax.block_until_ready(scores)

    ref = sim_model_reference(he_drug, he_disease, edge_src, edge_dst, params)

    assert scores.shape == (n_edges,)
    assert bool(jnp.all(jnp.isfinite(scores)))
    assert bool(jnp.all((scores >= 0.0) & (scores <= 1.0)))
    assert bool(jnp.allclose(scores, ref, atol=1e-4, rtol=1e-4))
    print("KERNEL_OK")
</pallas_src>

<mosaic_0001>
module attributes {stable_mosaic.version = 11 : i64} {
  func.func @sim_mlp_kernel(%arg0: i32, %arg1: i32, %arg2: memref<32x128xf32, #tpu.memory_space<vmem>>, %arg3: memref<16x35xf32, #tpu.memory_space<vmem>>, %arg4: memref<8x19xf32, #tpu.memory_space<vmem>>, %arg5: memref<1x9xf32, #tpu.memory_space<vmem>>, %arg6: memref<1x128xf32, #tpu.memory_space<vmem>>, %arg7: memref<16x1xf32, #tpu.memory_space<vmem>>, %arg8: memref<16x1xf32, #tpu.memory_space<vmem>>, %arg9: memref<8x1xf32, #tpu.memory_space<vmem>>, %arg10: memref<8x1xf32, #tpu.memory_space<vmem>>) attributes {dimension_semantics = [#tpu.dimension_semantics<arbitrary>, #tpu.dimension_semantics<arbitrary>], iteration_bounds = array<i64: 3, 1>, scalar_prefetch = 0 : i64, scratch_operands = 4 : i64, tpu.core_type = #tpu.core_type<tc>, window_params = [{transform_indices = @transform_0, window_bounds = array<i64: 32, 128>}, {pipeline_mode = #tpu.pipeline_mode<synchronous>, transform_indices = @transform_1, window_bounds = array<i64: 16, 35>}, {pipeline_mode = #tpu.pipeline_mode<synchronous>, transform_indices = @transform_2, window_bounds = array<i64: 8, 19>}, {pipeline_mode = #tpu.pipeline_mode<synchronous>, transform_indices = @transform_3, window_bounds = array<i64: 1, 9>}, {transform_indices = @transform_4, window_bounds = array<i64: 1, 128>}]} {
    %c0_i32 = arith.constant 0 : i32
    %0 = arith.cmpi eq, %arg0, %c0_i32 : i32
    %c0_i32_0 = arith.constant 0 : i32
    %1 = arith.cmpi eq, %arg1, %c0_i32_0 : i32
    %2 = arith.andi %0, %1 : i1
    %3 = arith.extui %2 : i1 to i32
    %c0_i32_1 = arith.constant 0 : i32
    %4 = arith.cmpi ne, %3, %c0_i32_1 : i32
    scf.if %4 {
      %cst_13 = arith.constant 0.000000e+00 : f32
      %29 = vector.broadcast %cst_13 : f32 to vector<16x1xf32>
      %c0_14 = arith.constant 0 : index
      %c0_15 = arith.constant 0 : index
      %30 = vector.load %arg7[%c0_14, %c0_15] : memref<16x1xf32, #tpu.memory_space<vmem>>, vector<16x1xf32>
      tpu.vector_store %arg7[%c0_14, %c0_15], %29 {strides = array<i32>} : memref<16x1xf32, #tpu.memory_space<vmem>>, vector<16x1xf32>,
      %cst_16 = arith.constant 0.000000e+00 : f32
      %31 = vector.broadcast %cst_16 : f32 to vector<16x1xf32>
      %c0_17 = arith.constant 0 : index
      %c0_18 = arith.constant 0 : index
      %32 = vector.load %arg8[%c0_17, %c0_18] : memref<16x1xf32, #tpu.memory_space<vmem>>, vector<16x1xf32>
      tpu.vector_store %arg8[%c0_17, %c0_18], %31 {strides = array<i32>} : memref<16x1xf32, #tpu.memory_space<vmem>>, vector<16x1xf32>,
      %cst_19 = arith.constant 0.000000e+00 : f32
      %33 = vector.broadcast %cst_19 : f32 to vector<8x1xf32>
      %c0_20 = arith.constant 0 : index
      %c0_21 = arith.constant 0 : index
      %34 = vector.load %arg9[%c0_20, %c0_21] : memref<8x1xf32, #tpu.memory_space<vmem>>, vector<8x1xf32>
      tpu.vector_store %arg9[%c0_20, %c0_21], %33 {strides = array<i32>} : memref<8x1xf32, #tpu.memory_space<vmem>>, vector<8x1xf32>,
      %cst_22 = arith.constant 0.000000e+00 : f32
      %35 = vector.broadcast %cst_22 : f32 to vector<8x1xf32>
      %c0_23 = arith.constant 0 : index
      %c0_24 = arith.constant 0 : index
      %36 = vector.load %arg10[%c0_23, %c0_24] : memref<8x1xf32, #tpu.memory_space<vmem>>, vector<8x1xf32>
      tpu.vector_store %arg10[%c0_23, %c0_24], %35 {strides = array<i32>} : memref<8x1xf32, #tpu.memory_space<vmem>>, vector<8x1xf32>,
    } else {
    }
    %c0 = arith.constant 0 : index
    %c0_2 = arith.constant 0 : index
    %5 = vector.load %arg2[%c0, %c0_2] : memref<32x128xf32, #tpu.memory_space<vmem>>, vector<32x128xf32>
    %c0_3 = arith.constant 0 : index
    %c0_4 = arith.constant 0 : index
    %6 = vector.load %arg3[%c0_3, %c0_4] : memref<16x35xf32, #tpu.memory_space<vmem>>, vector<16x32xf32>
    %c0_5 = arith.constant 0 : index
    %c32 = arith.constant 32 : index
    %7 = vector.load %arg3[%c0_5, %c32] : memref<16x35xf32, #tpu.memory_space<vmem>>, vector<16x1xf32>
    %c0_6 = arith.constant 0 : index
    %c33 = arith.constant 33 : index
    %8 = vector.load %arg3[%c0_6, %c33] : memref<16x35xf32, #tpu.memory_space<vmem>>, vector<16x1xf32>
    %c0_7 = arith.constant 0 : index
    %c34 = arith.constant 34 : index
    %9 = vector.load %arg3[%c0_7, %c34] : memref<16x35xf32, #tpu.memory_space<vmem>>, vector<16x1xf32>
    %cst = arith.constant dense<0.000000e+00> : vector<16x128xf32>
    %10 = tpu.matmul %6, %5, %cst {dimension_numbers = #tpu.dot_dimension_numbers<[1], [0], [0], [1], [0, 0, 1, 1], [], []>} : vector<16x32xf32>, vector<32x128xf32>, vector<16x128xf32> -> vector<16x128xf32>
    %11 = vector.broadcast %7 : vector<16x1xf32> to vector<16x128xf32>
    %12 = arith.addf %10, %11 : vector<16x128xf32>
    %c128_i32 = arith.constant 128 : i32
    %13 = arith.muli %arg1, %c128_i32 : i32
    %c8_i32 = arith.constant 8 : i32
    %14 = arith.subi %c8_i32, %13 : i32
    %15 = tpu.iota {dimensions = array<i32: 0>} : vector<128x1xi32>
    %16 = vector.broadcast %14 : i32 to vector<128x1xi32>
    %17 = arith.cmpi slt, %15, %16 : vector<128x1xi32>
    %18 = arith.extui %17 : vector<128x1xi1> to vector<128x1xi32>
    %19 = arith.sitofp %18 : vector<128x1xi32> to vector<128x1xf32>
    %c2_i32 = arith.constant 2 : i32
    %20 = arith.cmpi slt, %arg0, %c2_i32 : i32
    %21 = arith.extui %20 : i1 to i32
    %c0_i32_8 = arith.constant 0 : i32
    %22 = arith.cmpi ne, %21, %c0_i32_8 : i32
    scf.if %22 {
      %cst_13 = arith.constant 0.000000e+00 : f32
      %29 = vector.broadcast %cst_13 : f32 to vector<1x128xf32>
      %c0_14 = arith.constant 0 : index
      %c0_15 = arith.constant 0 : index
      %30 = vector.load %arg6[%c0_14, %c0_15] : memref<1x128xf32, #tpu.memory_space<vmem>>, vector<1x128xf32>
      tpu.vector_store %arg6[%c0_14, %c0_15], %29 {strides = array<i32>} : memref<1x128xf32, #tpu.memory_space<vmem>>, vector<1x128xf32>,
    } else {
    }
    %c0_i32_9 = arith.constant 0 : i32
    %23 = arith.cmpi eq, %arg0, %c0_i32_9 : i32
    %24 = arith.extui %23 : i1 to i32
    %c0_i32_10 = arith.constant 0 : i32
    %25 = arith.cmpi ne, %24, %c0_i32_10 : i32
    scf.if %25 {
      %c0_13 = arith.constant 0 : index
      %c0_14 = arith.constant 0 : index
      %29 = vector.load %arg7[%c0_13, %c0_14] : memref<16x1xf32, #tpu.memory_space<vmem>>, vector<16x1xf32>
      %cst_15 = arith.constant dense<0.000000e+00> : vector<16x1xf32>
      %30 = tpu.matmul %12, %19, %cst_15 {dimension_numbers = #tpu.dot_dimension_numbers<[1], [0], [0], [1], [0, 0, 1, 1], [], []>} : vector<16x128xf32>, vector<128x1xf32>, vector<16x1xf32> -> vector<16x1xf32>
      %31 = arith.addf %29, %30 : vector<16x1xf32>
      %c0_16 = arith.constant 0 : index
      %c0_17 = arith.constant 0 : index
      %32 = vector.load %arg7[%c0_16, %c0_17] : memref<16x1xf32, #tpu.memory_space<vmem>>, vector<16x1xf32>
      tpu.vector_store %arg7[%c0_16, %c0_17], %31 {strides = array<i32>} : memref<16x1xf32, #tpu.memory_space<vmem>>, vector<16x1xf32>,
      %c0_18 = arith.constant 0 : index
      %c0_19 = arith.constant 0 : index
      %33 = vector.load %arg8[%c0_18, %c0_19] : memref<16x1xf32, #tpu.memory_space<vmem>>, vector<16x1xf32>
      %34 = arith.mulf %12, %12 : vector<16x128xf32>
      %cst_20 = arith.constant dense<0.000000e+00> : vector<16x1xf32>
      %35 = tpu.matmul %34, %19, %cst_20 {dimension_numbers = #tpu.dot_dimension_numbers<[1], [0], [0], [1], [0, 0, 1, 1], [], []>} : vector<16x128xf32>, vector<128x1xf32>, vector<16x1xf32> -> vector<16x1xf32>
      %36 = arith.addf %33, %35 : vector<16x1xf32>
      %c0_21 = arith.constant 0 : index
      %c0_22 = arith.constant 0 : index
      %37 = vector.load %arg8[%c0_21, %c0_22] : memref<16x1xf32, #tpu.memory_space<vmem>>, vector<16x1xf32>
      tpu.vector_store %arg8[%c0_21, %c0_22], %36 {strides = array<i32>} : memref<16x1xf32, #tpu.memory_space<vmem>>, vector<16x1xf32>,
    } else {
    }
    %c0_i32_11 = arith.constant 0 : i32
    %26 = arith.cmpi sgt, %arg0, %c0_i32_11 : i32
    %27 = arith.extui %26 : i1 to i32
    %c0_i32_12 = arith.constant 0 : i32
    %28 = arith.cmpi ne, %27, %c0_i32_12 : i32
    scf.if %28 {
      %c0_13 = arith.constant 0 : index
      %c0_14 = arith.constant 0 : index
      %29 = vector.load %arg7[%c0_13, %c0_14] : memref<16x1xf32, #tpu.memory_space<vmem>>, vector<16x1xf32>
      %cst_15 = arith.constant 1.250000e-01 : f32
      %30 = vector.broadcast %cst_15 : f32 to vector<16x1xf32>
      %31 = arith.mulf %29, %30 : vector<16x1xf32>
      %c0_16 = arith.constant 0 : index
      %c0_17 = arith.constant 0 : index
      %32 = vector.load %arg8[%c0_16, %c0_17] : memref<16x1xf32, #tpu.memory_space<vmem>>, vector<16x1xf32>
      %cst_18 = arith.constant 1.250000e-01 : f32
      %33 = vector.broadcast %cst_18 : f32 to vector<16x1xf32>
      %34 = arith.mulf %32, %33 : vector<16x1xf32>
      %35 = arith.mulf %31, %31 : vector<16x1xf32>
      %36 = arith.subf %34, %35 : vector<16x1xf32>
      %cst_19 = arith.constant 9.99999974E-6 : f32
      %37 = vector.broadcast %cst_19 : f32 to vector<16x1xf32>
      %38 = arith.addf %36, %37 : vector<16x1xf32>
      %39 = math.rsqrt %38 : vector<16x1xf32>
      %40 = arith.mulf %8, %39 : vector<16x1xf32>
      %41 = vector.broadcast %31 : vector<16x1xf32> to vector<16x128xf32>
      %42 = arith.subf %12, %41 : vector<16x128xf32>
      %43 = vector.broadcast %40 : vector<16x1xf32> to vector<16x128xf32>
      %44 = arith.mulf %42, %43 : vector<16x128xf32>
      %45 = vector.broadcast %9 : vector<16x1xf32> to vector<16x128xf32>
      %46 = arith.addf %44, %45 : vector<16x128xf32>
      %cst_20 = arith.constant 0.000000e+00 : f32
      %47 = vector.broadcast %cst_20 : f32 to vector<16x128xf32>
      %48 = arith.maximumf %46, %47 : vector<16x128xf32>
      %c0_21 = arith.constant 0 : index
      %c0_22 = arith.constant 0 : index
      %49 = vector.load %arg4[%c0_21, %c0_22] : memref<8x19xf32, #tpu.memory_space<vmem>>, vector<8x16xf32>
      %c0_23 = arith.constant 0 : index
      %c16 = arith.constant 16 : index
      %50 = vector.load %arg4[%c0_23, %c16] : memref<8x19xf32, #tpu.memory_space<vmem>>, vector<8x1xf32>
      %c0_24 = arith.constant 0 : index
      %c17 = arith.constant 17 : index
      %51 = vector.load %arg4[%c0_24, %c17] : memref<8x19xf32, #tpu.memory_space<vmem>>, vector<8x1xf32>
      %c0_25 = arith.constant 0 : index
      %c18 = arith.constant 18 : index
      %52 = vector.load %arg4[%c0_25, %c18] : memref<8x19xf32, #tpu.memory_space<vmem>>, vector<8x1xf32>
      %cst_26 = arith.constant dense<0.000000e+00> : vector<8x128xf32>
      %53 = tpu.matmul %49, %48, %cst_26 {dimension_numbers = #tpu.dot_dimension_numbers<[1], [0], [0], [1], [0, 0, 1, 1], [], []>} : vector<8x16xf32>, vector<16x128xf32>, vector<8x128xf32> -> vector<8x128xf32>
      %54 = vector.broadcast %50 : vector<8x1xf32> to vector<8x128xf32>
      %55 = arith.addf %53, %54 : vector<8x128xf32>
      %c1_i32 = arith.constant 1 : i32
      %56 = arith.cmpi eq, %arg0, %c1_i32 : i32
      %57 = arith.extui %56 : i1 to i32
      %c0_i32_27 = arith.constant 0 : i32
      %58 = arith.cmpi ne, %57, %c0_i32_27 : i32
      scf.if %58 {
        %c0_30 = arith.constant 0 : index
        %c0_31 = arith.constant 0 : index
        %62 = vector.load %arg9[%c0_30, %c0_31] : memref<8x1xf32, #tpu.memory_space<vmem>>, vector<8x1xf32>
        %cst_32 = arith.constant dense<0.000000e+00> : vector<8x1xf32>
        %63 = tpu.matmul %55, %19, %cst_32 {dimension_numbers = #tpu.dot_dimension_numbers<[1], [0], [0], [1], [0, 0, 1, 1], [], []>} : vector<8x128xf32>, vector<128x1xf32>, vector<8x1xf32> -> vector<8x1xf32>
        %64 = arith.addf %62, %63 : vector<8x1xf32>
        %c0_33 = arith.constant 0 : index
        %c0_34 = arith.constant 0 : index
        %65 = vector.load %arg9[%c0_33, %c0_34] : memref<8x1xf32, #tpu.memory_space<vmem>>, vector<8x1xf32>
        tpu.vector_store %arg9[%c0_33, %c0_34], %64 {strides = array<i32>} : memref<8x1xf32, #tpu.memory_space<vmem>>, vector<8x1xf32>,
        %c0_35 = arith.constant 0 : index
        %c0_36 = arith.constant 0 : index
        %66 = vector.load %arg10[%c0_35, %c0_36] : memref<8x1xf32, #tpu.memory_space<vmem>>, vector<8x1xf32>
        %67 = arith.mulf %55, %55 : vector<8x128xf32>
        %cst_37 = arith.constant dense<0.000000e+00> : vector<8x1xf32>
        %68 = tpu.matmul %67, %19, %cst_37 {dimension_numbers = #tpu.dot_dimension_numbers<[1], [0], [0], [1], [0, 0, 1, 1], [], []>} : vector<8x128xf32>, vector<128x1xf32>, vector<8x1xf32> -> vector<8x1xf32>
        %69 = arith.addf %66, %68 : vector<8x1xf32>
        %c0_38 = arith.constant 0 : index
        %c0_39 = arith.constant 0 : index
        %70 = vector.load %arg10[%c0_38, %c0_39] : memref<8x1xf32, #tpu.memory_space<vmem>>, vector<8x1xf32>
        tpu.vector_store %arg10[%c0_38, %c0_39], %69 {strides = array<i32>} : memref<8x1xf32, #tpu.memory_space<vmem>>, vector<8x1xf32>,
      } else {
      }
      %c2_i32_28 = arith.constant 2 : i32
      %59 = arith.cmpi eq, %arg0, %c2_i32_28 : i32
      %60 = arith.extui %59 : i1 to i32
      %c0_i32_29 = arith.constant 0 : i32
      %61 = arith.cmpi ne, %60, %c0_i32_29 : i32
      scf.if %61 {
        %c0_30 = arith.constant 0 : index
        %c0_31 = arith.constant 0 : index
        %62 = vector.load %arg9[%c0_30, %c0_31] : memref<8x1xf32, #tpu.memory_space<vmem>>, vector<8x1xf32>
        %cst_32 = arith.constant 1.250000e-01 : f32
        %63 = vector.broadcast %cst_32 : f32 to vector<8x1xf32>
        %64 = arith.mulf %62, %63 : vector<8x1xf32>
        %c0_33 = arith.constant 0 : index
        %c0_34 = arith.constant 0 : index
        %65 = vector.load %arg10[%c0_33, %c0_34] : memref<8x1xf32, #tpu.memory_space<vmem>>, vector<8x1xf32>
        %cst_35 = arith.constant 1.250000e-01 : f32
        %66 = vector.broadcast %cst_35 : f32 to vector<8x1xf32>
        %67 = arith.mulf %65, %66 : vector<8x1xf32>
        %68 = arith.mulf %64, %64 : vector<8x1xf32>
        %69 = arith.subf %67, %68 : vector<8x1xf32>
        %cst_36 = arith.constant 9.99999974E-6 : f32
        %70 = vector.broadcast %cst_36 : f32 to vector<8x1xf32>
        %71 = arith.addf %69, %70 : vector<8x1xf32>
        %72 = math.rsqrt %71 : vector<8x1xf32>
        %73 = arith.mulf %51, %72 : vector<8x1xf32>
        %74 = vector.broadcast %64 : vector<8x1xf32> to vector<8x128xf32>
        %75 = arith.subf %55, %74 : vector<8x128xf32>
        %76 = vector.broadcast %73 : vector<8x1xf32> to vector<8x128xf32>
        %77 = arith.mulf %75, %76 : vector<8x128xf32>
        %78 = vector.broadcast %52 : vector<8x1xf32> to vector<8x128xf32>
        %79 = arith.addf %77, %78 : vector<8x128xf32>
        %cst_37 = arith.constant 0.000000e+00 : f32
        %80 = vector.broadcast %cst_37 : f32 to vector<8x128xf32>
        %81 = arith.maximumf %79, %80 : vector<8x128xf32>
        %c0_38 = arith.constant 0 : index
        %c0_39 = arith.constant 0 : index
        %82 = vector.load %arg5[%c0_38, %c0_39] : memref<1x9xf32, #tpu.memory_space<vmem>>, vector<1x8xf32>
        %c0_40 = arith.constant 0 : index
        %c8 = arith.constant 8 : index
        %83 = vector.load %arg5[%c0_40, %c8] : memref<1x9xf32, #tpu.memory_space<vmem>>, vector<1x1xf32>
        %cst_41 = arith.constant dense<0.000000e+00> : vector<1x128xf32>
        %84 = tpu.matmul %82, %81, %cst_41 {dimension_numbers = #tpu.dot_dimension_numbers<[1], [0], [0], [1], [0, 0, 1, 1], [], []>} : vector<1x8xf32>, vector<8x128xf32>, vector<1x128xf32> -> vector<1x128xf32>
        %85 = vector.broadcast %83 : vector<1x1xf32> to vector<1x128xf32>
        %86 = arith.addf %84, %85 : vector<1x128xf32>
        %87 = arith.negf %86 : vector<1x128xf32>
        %88 = math.exp %87 : vector<1x128xf32>
        %cst_42 = arith.constant 1.000000e+00 : f32
        %89 = vector.broadcast %cst_42 : f32 to vector<1x128xf32>
        %90 = arith.addf %89, %88 : vector<1x128xf32>
        %91 = arith.divf %89, %90 : vector<1x128xf32>
        %c0_43 = arith.constant 0 : index
        %c0_44 = arith.constant 0 : index
        %92 = vector.load %arg6[%c0_43, %c0_44] : memref<1x128xf32, #tpu.memory_space<vmem>>, vector<1x128xf32>
        tpu.vector_store %arg6[%c0_43, %c0_44], %91 {strides = array<i32>} : memref<1x128xf32, #tpu.memory_space<vmem>>, vector<1x128xf32>,
      } else {
      }
    } else {
    }
    return
  }
  func.func @transform_0(%arg0: i32, %arg1: i32) -> (i32, i32) {
    %c0_i32 = arith.constant 0 : i32
    %c0_i32_0 = arith.constant 0 : i32
    return %c0_i32, %arg1 : i32, i32
  }
  func.func @transform_1(%arg0: i32, %arg1: i32) -> (i32, i32) {
    %c0_i32 = arith.constant 0 : i32
    %c0_i32_0 = arith.constant 0 : i32
    %c0_i32_1 = arith.constant 0 : i32
    return %c0_i32, %c0_i32_0 : i32, i32
  }
  func.func @transform_2(%arg0: i32, %arg1: i32) -> (i32, i32) {
    %c0_i32 = arith.constant 0 : i32
    %c0_i32_0 = arith.constant 0 : i32
    %c0_i32_1 = arith.constant 0 : i32
    return %c0_i32, %c0_i32_0 : i32, i32
  }
  func.func @transform_3(%arg0: i32, %arg1: i32) -> (i32, i32) {
    %c0_i32 = arith.constant 0 : i32
    %c0_i32_0 = arith.constant 0 : i32
    %c0_i32_1 = arith.constant 0 : i32
    return %c0_i32, %c0_i32_0 : i32, i32
  }
  func.func @transform_4(%arg0: i32, %arg1: i32) -> (i32, i32) {
    %c0_i32 = arith.constant 0 : i32
    %c0_i32_0 = arith.constant 0 : i32
    return %c0_i32, %arg1 : i32, i32
  }
}

</mosaic_0001>

<bundles_post_ra>
// kernel: sim_model_forward.1
= control target key start
LH: loop header
LB: loop body
LE: loop exit
PB: predicated region body
PF: predicated region fallthrough
CT: control target
= control target key end

     0   :  { %s1265_s15 = smov 0   ;;  %s1267_s16 = smov 0   ;;  %s1366_s0 = inlined_call_operand.vmem [shape: f32[32,128], index: 0, kind: input, shape index: {}]   ;;  %s1367_s1 = inlined_call_operand.vmem [shape: f32[16,35], index: 1, kind: input, shape index: {}]   ;;  %s1368_s2 = inlined_call_operand.vmem [shape: f32[8,19], index: 2, kind: input, shape index: {}]   ;;  %s1369_s3 = inlined_call_operand.vmem [shape: f32[1,9], index: 3, kind: input, shape index: {}]   ;;  %s1370_s4 = inlined_call_operand.vmem [shape: f32[1,128], index: 4, kind: output, shape index: {}]  }
   0x1   :  { %s1269_s17 = smov 0  }
   0x2 LB: > { %s26_s18 = sadd.s32 1, %s1212_s16  ;;  %p1034_p0 = scmp.ge.s32.totalorder %s1216_s17, 1  ;;  %s1216_s17 = sphi %s1269_s17, %s14_s17   ;;  %s1212_s16 = sphi %s1267_s16, %s1372_s16   ;;  %s1208_s15 = sphi %s1265_s15, %s1371_s15  }
   0x3   : > { %p28_p1 = scmp.ge.s32.totalorder %s26_s18, 3  ;;  %p173_p2 = scmp.lt.s32.totalorder %s1216_s17, 4 }
   0x5   : > { %s1374_s18 = smov (%p28_p1, %s26_s18), 0  ;;  %p174_p3 = pnand %p1034_p0, %p173_p2 }
   0x6   : > { %p203_p4 = scmp.eq.s32.totalorder (!%p174_p3), %s1208_s15, 0 }
   0x7   : > { %177 = sbr.rel (%p174_p3) target bundleno = 1706 (0x6aa), region = 36 }
   0xe   : > { %208 = sbr.rel (!%p203_p4) target bundleno = 21 (0x15), region = 40  ;;  %vm209_vm0 = vcmask (%p203_p4), 7168   ;;  %v1218_v0 = vmov (%p203_p4), 0.0  }
   0xf   : > { %210 = vst.msk [vmem:[#allocation2] sm:$0xff] (%p203_p4), %vm209_vm0, %v1218_v0  ;;  %211 = vst.msk [vmem:[#allocation2 + $0x8] sm:$0xff] (%p203_p4), %vm209_vm0, %v1218_v0 }
  0x10   : > { %212 = vst.msk [vmem:[#allocation3] sm:$0xff] (%p203_p4), %vm209_vm0, %v1218_v0  ;;  %213 = vst.msk [vmem:[#allocation3 + $0x8] sm:$0xff] (%p203_p4), %vm209_vm0, %v1218_v0 }
  0x11   : > { %214 = vst.msk [vmem:[#allocation4] sm:$0xff] (%p203_p4), %vm209_vm0, %v1218_v0  ;;  %215 = vst.msk [vmem:[#allocation5] sm:$0xff] (%p203_p4), %vm209_vm0, %v1218_v0 }
  0x15 PF: > { %v216_v1 = vld [vmem:[%s1366_s0] sm:$0xff]  ;;  %v217_v2 = vld [vmem:[%s1366_s0 + $0x8] sm:$0xff]  ;;  %v218_v3 = vld [vmem:[%s1366_s0 + $0x10] sm:$0xff]  ;;  %vm232_vm1 = vcmask 261120   ;;  %v1219_v7 = vmov 32   ;;  %p1038_p5 = scmp.ge.s32.totalorder %s1208_s15, 2 }
  0x16   : > { %v1114_v4 = vpack.c.bf16 %v217_v2, %v216_v1  ;;  %v219_v5 = vld [vmem:[%s1366_s0 + $0x18] sm:$0xff]  ;;  %v1301_v6 = vld [vmem:[%s1367_s1] sm:$0xff]  ;;  %1171 = vset.pattern.permute.xlu0 %v1219_v7  ;;  %v1308_v9 = vld [vmem:[%s1367_s1 + $0x8] sm:$0xff]  ;;  %v1220_v16 = vmov (!%p1038_p5), 0.0  }
  0x17   : > { %v1118_v8 = vpack.c.bf16 %v219_v5, %v218_v3  ;;  %1079 = vmatprep.mubr.msk.f32.mxu0 %vm232_vm1, %v1301_v6  ;;  %224 = vperm.xlu0 %1171, %v1301_v6   ;;  %384 = vst [vmem:[%s1370_s4] sm:$0x1] (!%p1038_p5), %v1220_v16 }
  0x18   : > { %1115 = vmatprep.subr.bf16.mxu0 %v1114_v4 }
  0x19   : > { %1117 = vmatpush3.bf16.msra.mxu0 %v1114_v4 }
  0x1a   : > { %1119 = vmatprep.subr.bf16.mxu0 %v1118_v8 }
  0x1b   : > { %229 = vperm.xlu0 %1171, %v1308_v9  }
  0x1d   : > { %1121 = vmatpush3.bf16.msra.mxu0 %v1118_v8 }
  0x20   : > { %1080 = vmatmul.mubr.msk.f32.vlgmr.msra.gmra.mrb[0].mxu0 %vm232_vm1, %v1308_v9 }
  0x96   : > { %v225_v10 = vpop.permute.xlu0 %224 }
  0x9a   : > { %v230_v11 = vpop.permute.xlu0 %229 }
  0xef   : > { %383 = sbr.rel (%p1038_p5) target bundleno = 246 (0xf6), region = 44 }
  0xf3   : > { %v1081_v12 = vpop.f32.mrb[0].mxu0 }
  0xf4   : > { %v1312_v13 = vadd.f32 %v1081_v12, %v230_v11  ;;  %v303_v14 = vpop.f32.mrb[1].mxu0 }
  0xf5   : > { %v1314_v15 = vadd.f32 %v303_v14, %v225_v10 }
  0xf6 PF: > { %p1039_p6 = scmp.ne.s32.totalorder %s1208_s15, 0 }
  0xf7   : > { %1084 = vmatprep.mubr.f32.mxu0 (!%p1039_p6), %v1314_v15  ;;  %v472_v17 = vmul.f32 (!%p1039_p6), %v1314_v15, %v1314_v15  ;;  %v473_v18 = vmul.f32 (!%p1039_p6), %v1312_v13, %v1312_v13  ;;  %v1221_v19 = vmov (!%p1039_p6), 1.0   ;;  %v389_v20 = vld [vmem:[#allocation2 + $0x8] sm:$0xff] (!%p1039_p6)  ;;  %v471_v21 = vld [vmem:[#allocation3 + $0x8] sm:$0xff] (!%p1039_p6)  ;;  %v388_v22 = vld [vmem:[#allocation2] sm:$0xff] (!%p1039_p6)  ;;  %vm467_vm2 = vcmask (!%p1039_p6), 7168  }
  0xf8   : > { %387 = sbr.rel (%p1039_p6) target bundleno = 467 (0x1d3), region = 48  ;;  %1082 = vmatprep.subr.mxu0 (!%p1039_p6), %v1221_v19  ;;  %1087 = vmatprep.subr.mxu1 (!%p1039_p6), %v1221_v19  ;;  %v470_v24 = vld [vmem:[#allocation3] sm:$0xff] (!%p1039_p6) }
  0xf9   : > { %1083 = vmatpush3.msra.mxu0 (!%p1039_p6), %v1221_v19  ;;  %1088 = vmatpush3.msra.mxu1 (!%p1039_p6), %v1221_v19 }
  0xfa   : > { %1089 = vmatprep.mubr.f32.mxu1 (!%p1039_p6), %v472_v17  ;;  %1085 = vmatmul.mubr.f32.vlgmr.msra.gmra.mrb[0].mxu0 (!%p1039_p6), %v1312_v13 }
  0xfb   : > { %1090 = vmatmul.mubr.f32.vlgmr.msra.gmra.mrb[0].mxu1 (!%p1039_p6), %v473_v18 }
 0x1cd   : > { %v1086_v23 = vpop.f32.mrb[0].mxu0 }
 0x1ce   : > { %v466_v25 = vadd.f32 %v1086_v23, %v389_v20  ;;  %v1091_v26 = vpop.f32.mrb[0].mxu1  ;;  %v456_v27 = vpop.f32.mrb[1].mxu0 }
 0x1cf   : > { %v550_v28 = vadd.f32 %v1091_v26, %v471_v21  ;;  %v465_v29 = vadd.f32 %v456_v27, %v388_v22  ;;  %v540_v30 = vpop.f32.mrb[1].mxu1 }
 0x1d0   : > { %469 = vst.msk [vmem:[#allocation2 + $0x8] sm:$0xff] %vm467_vm2, %v466_v25  ;;  %v549_v31 = vadd.f32 %v540_v30, %v470_v24 }
 0x1d1   : > { %552 = vst.msk [vmem:[#allocation3 + $0x8] sm:$0xff] %vm467_vm2, %v550_v28  ;;  %468 = vst.msk [vmem:[#allocation2] sm:$0xff] %vm467_vm2, %v465_v29 }
 0x1d2   : > { %551 = vst.msk [vmem:[#allocation3] sm:$0xff] %vm467_vm2, %v549_v31 }
 0x1d3 PF: > { %p1040_p7 = scmp.le.s32.totalorder %s1208_s15, 0 }
 0x1d4   : > { %v1222_v39 = vmov (!%p1040_p7), 0   ;;  %v1223_v47 = vmov (!%p1040_p7), 33   ;;  %s1224_s7 = smov (!%p1040_p7), 33   ;;  %v1225_v54 = vmov (!%p1040_p7), 34   ;;  %v1226_v55 = vmov (!%p1040_p7), 0.0|0.0   ;;  %v1335_v57 = vld [vmem:[%s1368_s2] sm:$0xff] (!%p1040_p7) }
 0x1d5   : > { %556 = sbr.rel (%p1040_p7) target bundleno = 1706 (0x6aa), region = 52  ;;  %1172 = vset.pattern.permute.xlu1 (!%p1040_p7), %v1222_v39  ;;  %1173 = vset.pattern.permute.xlu0 (!%p1040_p7), %v1223_v47  ;;  %vm1227_vm3 = vmmov (!%p1040_p7), 0   ;;  %v1228_v56 = vmov (!%p1040_p7), 0.0   ;;  %v1229_v58 = vmov (!%p1040_p7), 16   ;;  %vm625_vm4 = vcmask (!%p1040_p7), 130048   ;;  %p1042_p8 = scmp.ne.s32.totalorder (!%p1040_p7), %s1208_s15, 1 }
 0x1d6   : > { %1122 = vmatprep.subr.bf16.mxu0 (!%p1040_p7), %v1226_v55  ;;  %1096 = vmatprep.mubr.msk.f32.mxu0 (!%p1040_p7), %vm1227_vm3, %v1228_v56 }
 0x1d7   : > { %v558_v34 = vld [vmem:[#allocation2 + $0x8] sm:$0xff] (!%p1040_p7) }
 0x1d8   : > { %v557_v32 = vld [vmem:[#allocation2] sm:$0xff] (!%p1040_p7)  ;;  %v560_v37 = vmul.f32 (!%p1040_p7), 0.125, %v558_v34  ;;  %v562_v38 = vld [vmem:[#allocation3 + $0x8] sm:$0xff] (!%p1040_p7) }
 0x1d9   : > { %v561_v33 = vld [vmem:[#allocation3] sm:$0xff] (!%p1040_p7)  ;;  %v559_v35 = vmul.f32 (!%p1040_p7), 0.125, %v557_v32  ;;  %v564_v40 = vmul.f32 (!%p1040_p7), 0.125, %v562_v38 }
 0x1da   : > { %v563_v36 = vmul.f32 (!%p1040_p7), 0.125, %v561_v33  ;;  %v566_v42 = vmul.f32 (!%p1040_p7), %v560_v37, %v560_v37 }
 0x1db   : > { %v565_v41 = vmul.f32 (!%p1040_p7), %v559_v35, %v559_v35  ;;  %585 = vperm.xlu1 (!%p1040_p7), %1172, %v559_v35  }
 0x1dc   : > { %v568_v44 = vsub.f32 %v564_v40, %v566_v42  ;;  %v1231_v16 = vmov (!%p1042_p8), 1.0   ;;  %vm1232_vm5 = vmmov (!%p1042_p8), 0   ;;  %v702_v17 = vld [vmem:[#allocation4] sm:$0xff] (!%p1042_p8)  ;;  %v776_v18 = vld [vmem:[#allocation5] sm:$0xff] (!%p1042_p8)  ;;  %vm774_vm6 = vcmask (!%p1042_p8), 7168  }
 0x1dd   : > { %v567_v43 = vsub.f32 %v563_v36, %v565_v41 }
 0x1de   : > { %v570_v46 = vadd.f32 1e-05, %v568_v44 }
 0x1df   : > { %v569_v45 = vadd.f32 1e-05, %v567_v43  ;;  %590 = vperm.xlu1 %1172, %v560_v37  }
 0x1e1   : > { %1179 = vrsqrt.f32 %v569_v45 }
 0x1e2   : > { %1181 = vrsqrt.f32 %v570_v46 }
 0x1e3   : > { %1174 = vset.pattern.permute.xlu1 %v1223_v47 }
 0x1eb   : > { %v1180_v48 = vpop.eup %1179 }
 0x1ec   : > { %575 = vrot.lane.b32.xlu0 %v1180_v48, %s1224_s7  ;;  %v1182_v49 = vpop.eup %1181 }
 0x1f0   : > { %577 = vrot.lane.b32.xlu0 %v1182_v49, %s1224_s7 }
 0x25a   : > { %v586_v59 = vpop.permute.xlu1 %585 }
 0x25b   : > { %v593_v2 = vsub.f32 %v1314_v15, %v586_v59  ;;  %v1230_v15 = vmov (!%p1042_p8), 0.0  }
 0x25c   : > { %1104 = vmatprep.subr.mxu1 (!%p1042_p8), %v1230_v15  ;;  %1106 = vmatprep.mubr.msk.f32.mxu1 (!%p1042_p8), %vm1232_vm5, %v1230_v15 }
 0x25d   : > { %1105 = vmatpush3.msra.mxu1 (!%p1042_p8), %v1231_v16 }
 0x25e   : > { %v576_v50 = vpop.permute.xlu0 %575  ;;  %v591_v60 = vpop.permute.xlu1 %590 }
 0x25f   : > { %v581_v51 = vmul.f32 %v576_v50, %v1301_v6  ;;  %v594_v62 = vsub.f32 %v1312_v13, %v591_v60 }
 0x261   : > { %597 = vperm.xlu0 %1173, %v581_v51  }
 0x262   : > { %v578_v52 = vpop.permute.xlu0 %577 }
 0x263   : > { %v582_v53 = vmul.f32 %v578_v52, %v1308_v9 }
 0x265   : > { %602 = vperm.xlu1 %1174, %v582_v53   ;;  %1176 = vset.pattern.permute.xlu0 %v1225_v54 }
 0x266   : > { %612 = vperm.xlu0 %1176, %v1308_v9  }
 0x269   : > { %1175 = vset.pattern.permute.xlu1 %v1225_v54 }
 0x26a   : > { %608 = vperm.xlu1 %1175, %v1301_v6   ;;  %1178 = vset.pattern.permute.xlu0 %v1229_v58 }
 0x26e   : > { %1177 = vset.pattern.permute.xlu1 %v1229_v58 }
 0x26f   : > { %622 = vperm.xlu1 %1177, %v1335_v57  }
 0x2e0   : > { %v598_v61 = vpop.permute.xlu0 %597 }
 0x2e1   : > { %v605_v3 = vmul.f32 %v598_v61, %v593_v2 }
 0x2e4   : > { %v603_v63 = vpop.permute.xlu1 %602 }
 0x2e5   : > { %v606_v0 = vmul.f32 %v603_v63, %v594_v62  ;;  %v613_v1 = vpop.permute.xlu0 %612 }
 0x2e7   : > { %v616_v4 = vadd.f32 %v613_v1, %v606_v0 }
 0x2e9   : > { %v609_v5 = vpop.permute.xlu1 %608  ;;  %v618_v7 = vmax.f32 %v616_v4, 0.0 }
 0x2ea   : > { %v615_v6 = vadd.f32 %v609_v5, %v605_v3 }
 0x2ec   : > { %v617_v8 = vmax.f32 %v615_v6, 0.0 }
 0x2ee   : > { %v1123_v9 = vpack.c.bf16 %v618_v7, %v617_v8  ;;  %v623_v10 = vpop.permute.xlu1 %622 }
 0x2f0   : > { %1124 = vmatpush3.bf16.msra.mxu0 %v1123_v9 }
 0x2f1   : > { %1099 = vmatprep.subr.mxu0 (!%p1042_p8), %v1230_v15 }
 0x2f3   : > { %1097 = vmatmul.mubr.msk.f32.vlgmr.msra.gmra.mrb[0].mxu0 %vm625_vm4, %v1335_v57 }
 0x2f4   : > { %1100 = vmatpush3.msra.mxu0 (!%p1042_p8), %v1231_v16  ;;  %1101 = vmatprep.mubr.msk.f32.mxu0 (!%p1042_p8), %vm1232_vm5, %v1230_v15 }
 0x3c1   : > { %701 = sbr.rel (%p1042_p8) target bundleno = 1186 (0x4a2), region = 56 }
 0x3c6   : > { %v694_v11 = vpop.f32.mrb[0].mxu0 }
 0x3c7   : > { %v1341_v12 = vadd.f32 %v694_v11, %v623_v10  ;;  %v1098_v13 = vpop.f32.mrb[1].mxu0 }
 0x3c9   : > { %v777_v14 = vmul.f32 %v1341_v12, %v1341_v12  ;;  %1102 = vmatmul.mubr.f32.vlgmr.msra.gmra.mrb[0].mxu0 %v1341_v12 }
 0x3cb   : > { %1107 = vmatmul.mubr.f32.vlgmr.msra.gmra.mrb[0].mxu1 %v777_v14 }
 0x49c   : > { %v769_v19 = vpop.f32.mrb[0].mxu0 }
 0x49d   : > { %v773_v21 = vadd.f32 %v769_v19, %v702_v17  ;;  %v1103_v23 = vpop.f32.mrb[1].mxu0 }
 0x49e   : > { %v844_v20 = vpop.f32.mrb[0].mxu1 }
 0x49f   : > { %v848_v22 = vadd.f32 %v844_v20, %v776_v18  ;;  %v1108_v24 = vpop.f32.mrb[1].mxu1  ;;  %775 = vst.msk [vmem:[#allocation4] sm:$0xff] %vm774_vm6, %v773_v21 }
 0x4a1   : > { %849 = vst.msk [vmem:[#allocation5] sm:$0xff] %vm774_vm6, %v848_v22 }
 0x4a2 PF: > { %p1043_p9 = scmp.ne.s32.totalorder %s1208_s15, 2 }
 0x4a3   : > { %v1233_v29 = vmov (!%p1043_p9), 0   ;;  %v1234_v33 = vmov (!%p1043_p9), 17   ;;  %s1235_s10 = smov (!%p1043_p9), 17   ;;  %v1236_v37 = vmov (!%p1043_p9), 18   ;;  %v1237_v38 = vmov (!%p1043_p9), 0.0  }
 0x4a4   : > { %853 = sbr.rel (%p1043_p9) target bundleno = 1706 (0x6aa), region = 60  ;;  %1183 = vset.pattern.permute.xlu0 (!%p1043_p9), %v1233_v29  ;;  %1184 = vset.pattern.permute.xlu1 (!%p1043_p9), %v1234_v33  ;;  %vm1238_vm7 = vmmov (!%p1043_p9), 0   ;;  %v885_v39 = vld [vmem:[%s1369_s3] sm:$0x1] (!%p1043_p9)  ;;  %v1239_v40 = vmov (!%p1043_p9), 8   ;;  %vm895_vm8 = vcmask (!%p1043_p9), 64512   ;;  %v891_v48 = vlaneseq (!%p1043_p9) }
 0x4a5   : > { %1109 = vmatprep.subr.mxu0 (!%p1043_p9), %v1237_v38  ;;  %1111 = vmatprep.mubr.msk.f32.mxu0 (!%p1043_p9), %vm1238_vm7, %v1237_v38 }
 0x4a6   : > { %v854_v25 = vld [vmem:[#allocation4] sm:$0xff] (!%p1043_p9)  ;;  %v892_v49 = vshrl.u32 (!%p1043_p9), %v891_v48, 7 }
 0x4a7   : > { %v855_v27 = vmul.f32 (!%p1043_p9), 0.125, %v854_v25 }
 0x4a8   : > { %v856_v26 = vld [vmem:[#allocation5] sm:$0xff] (!%p1043_p9)  ;;  %v893_v50 = vsub.s32 (!%p1043_p9), 0, %v892_v49 }
 0x4a9   : > { %v857_v28 = vmul.f32 (!%p1043_p9), 0.125, %v856_v26  ;;  %v858_v30 = vmul.f32 (!%p1043_p9), %v855_v27, %v855_v27 }
 0x4ab   : > { %v859_v31 = vsub.f32 %v857_v28, %v858_v30 }
 0x4ad   : > { %v860_v32 = vadd.f32 1e-05, %v859_v31 }
 0x4af   : > { %1188 = vrsqrt.f32 %v860_v32 }
 0x4b9   : > { %v1189_v34 = vpop.eup %1188 }
 0x4ba   : > { %863 = vrot.lane.b32.xlu0 %v1189_v34, %s1235_s10 }
 0x4be   : > { %869 = vperm.xlu0 %1183, %v855_v27  }
 0x4c2   : > { %1187 = vset.pattern.permute.xlu0 %v1239_v40 }
 0x52c   : > { %v864_v35 = vpop.permute.xlu0 %863 }
 0x52d   : > { %v866_v36 = vmul.f32 %v864_v35, %v1335_v57 }
 0x52f   : > { %875 = vperm.xlu1 %1184, %v866_v36  }
 0x533   : > { %1185 = vset.pattern.permute.xlu1 %v1236_v37 }
 0x534   : > { %880 = vperm.xlu1 %1185, %v1335_v57  }
 0x538   : > { %1186 = vset.pattern.permute.xlu1 %v1239_v40 }
 0x539   : > { %888 = vperm.xlu1 %1186, %v885_v39  }
 0x53d   : > { %v870_v41 = vpop.permute.xlu0 %869 }
 0x53e   : > { %v872_v42 = vsub.f32 %v1341_v12, %v870_v41 }
 0x5ae   : > { %v876_v43 = vpop.permute.xlu1 %875 }
 0x5af   : > { %v878_v44 = vmul.f32 %v876_v43, %v872_v42 }
 0x5b3   : > { %v881_v45 = vpop.permute.xlu1 %880 }
 0x5b4   : > { %v883_v46 = vadd.f32 %v881_v45, %v878_v44 }
 0x5b6   : > { %v884_v47 = vmax.f32 %v883_v46, 0.0 }
 0x5b8   : > { %1110 = vmatpush3.msra.mxu0 %v884_v47  ;;  %v889_v51 = vpop.permute.xlu1 %888 }
 0x5b9   : > { %1112 = vmatmul.mubr.msk.f32.vlgmr.msra.gmra.mrb[0].mxu0 %vm895_vm8, %v885_v39  ;;  %v894_v52 = vrot.slane %v889_v51, %v893_v50 }
 0x68c   : > { %v964_v53 = vpop.f32.mrb[0].mxu0 }
 0x68d   : > { %v965_v54 = vadd.f32 %v964_v53, %v894_v52  ;;  %v1113_v55 = vpop.f32.mrb[1].mxu0 }
 0x68f   : > { %v1045_v56 = vmul.f32 -1.442695, %v965_v54 }
 0x691   : > { %1190 = vpow2.f32 %v1045_v56 }
 0x69b   : > { %v1191_v57 = vpop.eup %1190 }
 0x69c   : > { %v971_v58 = vadd.f32 1.0, %v1191_v57 }
 0x69e   : > { %1192 = vrcp.f32 %v971_v58 }
 0x6a8   : > { %v1193_v59 = vpop.eup %1192 }
 0x6a9   : > { %974 = vst [vmem:[%s1370_s4] sm:$0x1] %v1193_v59 }
 0x6aa PF: > { %s14_s17 = sadd.s32 1, %s1216_s17   ;;  %s1371_s15 = smov %s1212_s16 }
 0x6ab   : > { %p11_p10 = scmp.ge.s32.totalorder %s14_s17, 5   ;;  %s1372_s16 = smov %s1374_s18 }
 0x6ad   :  { %13 = sbr.rel (!%p11_p10) target bundleno = 2 (0x2), region = 90 }

</bundles_post_ra>
